<compile_context>
chip_gen: v6e
topology: v6e:2x2x1
jax: 0.10.0
libtpu: 0.0.40
codegen_flags: <defaults>
</compile_context>

<pallas_src>
import math
import numpy as np
import jax
import jax.numpy as jnp
from jax.experimental import pallas as pl
from jax.experimental.pallas import tpu as pltpu

H1, H2, H3, HOUT = 256, 128, 64, 1
BN_EPS = 1e-5
LEAKY_SLOPE = 0.1


def _leaky_relu(x, slope=LEAKY_SLOPE):
    return jnp.where(x > 0, x, slope * x)


def _round_up(n, m):
    return ((n + m - 1) // m) * m


# ----------------------------------------------------------------------------
# Kernel
# ----------------------------------------------------------------------------
def tlmlp_kernel(x_ref,
                 w1_ref, t1_ref,
                 w2_ref, t2_ref,
                 w3_ref, t3_ref,
                 w4_ref, b4_ref,
                 o_ref):
    """Fused eval-mode MLP: 3x (Linear+BN folded -> LeakyReLU) -> Linear(64,1)."""
    # Matmuls run on the MXU in the storage dtype (f32 or bf16) with f32
    # accumulation; all elementwise work stays in f32.
    h = jnp.dot(x_ref[...], w1_ref[...], preferred_element_type=jnp.float32)
    h = _leaky_relu(h + t1_ref[...])

    h = jnp.dot(h.astype(w2_ref.dtype), w2_ref[...],
                preferred_element_type=jnp.float32)
    h = _leaky_relu(h + t2_ref[...])

    h = jnp.dot(h.astype(w3_ref.dtype), w3_ref[...],
                preferred_element_type=jnp.float32)
    h = _leaky_relu(h + t3_ref[...])

    # Final Linear(64, 1): an N=1 MXU matmul wastes the array and produces a
    # 1-lane result; do it as a VPU multiply + cross-lane reduction instead
    # (w4 is passed pre-transposed as a (1, 64) row).
    y = jnp.sum(h * w4_ref[...], axis=-1, keepdims=True) + b4_ref[...]
    o_ref[...] = y.astype(o_ref.dtype)


# ----------------------------------------------------------------------------
# Parameter folding + wrapper
# ----------------------------------------------------------------------------
def fold_params(params, compute_dtype=jnp.float32):
    """Fold BN (eval) scale/shift and Linear bias into the weights.

    W' = W * s (column-wise), t' = b * s + t   =>   h = leaky(x @ W' + t')
    Matmul weights are cast to `compute_dtype`; shifts / w4 / b4 stay f32.
    """
    (w1, b1, s1, t1, w2, b2, s2, t2, w3, b3, s3, t3, w4, b4) = params

    def fold(w, b, s, t):
        return (w * s).astype(compute_dtype), (b * s + t).astype(jnp.float32)

    w1f, t1f = fold(w1, b1, s1, t1)
    w2f, t2f = fold(w2, b2, s2, t2)
    w3f, t3f = fold(w3, b3, s3, t3)
    w4r = jnp.transpose(w4).astype(jnp.float32)        # (1, 64) row
    return (w1f, t1f, w2f, t2f, w3f, t3f, w4r, b4.astype(jnp.float32))


def tlmlp_forward(x, params, *, tb=512, compute_dtype=jnp.float32):
    B, input_dim = x.shape
    w1, t1, w2, t2, w3, t3, w4r, b4 = fold_params(params, compute_dtype)

    # Batch tile: big (MXU row fill + per-step amortization) but never larger
    # than the 8-aligned batch.  Zero-pad B so any batch size works.
    tb = _round_up(min(max(tb, 8), _round_up(B, 8)), 8)
    B_pad = _round_up(B, tb)

    x_c = x.astype(compute_dtype)
    if B_pad != B:
        x_c = jnp.pad(x_c, ((0, B_pad - B), (0, 0)))

    def whole(arr):                       # weight / shift: resident every step
        return pl.BlockSpec(arr.shape, lambda i: (0, 0))

    in_specs = [
        pl.BlockSpec((tb, input_dim), lambda i: (i, 0)),   # x tile
        whole(w1), whole(t1),
        whole(w2), whole(t2),
        whole(w3), whole(t3),
        whole(w4r), whole(b4),
    ]

    # Total VMEM footprint (weights + double-buffered x tile + intermediates)
    # is a few MiB even at tb=1024, well under the 32 MiB scoped default on
    # v5e/v6e/v7x, so no vmem_limit_bytes override is needed.
    out = pl.pallas_call(
        tlmlp_kernel,
        out_shape=jax.ShapeDtypeStruct((B_pad, HOUT), jnp.float32),
        grid_spec=pltpu.PrefetchScalarGridSpec(
            num_scalar_prefetch=0,
            grid=(B_pad // tb,),
            in_specs=in_specs,
            out_specs=pl.BlockSpec((tb, HOUT), lambda i: (i, 0)),
        ),
        compiler_params=pltpu.CompilerParams(
            dimension_semantics=("parallel",)),
    )(x_c, w1, t1, w2, t2, w3, t3, w4r, b4)

    return out[:B]


# ----------------------------------------------------------------------------
# Init (mirrors the PyTorch module) + references
# ----------------------------------------------------------------------------
def init_params(key, input_dim):
    """Shapes/init mirroring the PyTorch module (eval mode).

    Linear weights: kaiming_normal_(mode='fan_in', nonlinearity='leaky_relu')
      with torch's default a=0  ->  std = sqrt(2) / sqrt(fan_in).
    Linear biases: PyTorch default U(-1/sqrt(fan_in), 1/sqrt(fan_in)).
    BatchNorm (eval, fresh): gamma=1, beta=0, mean=0, var=1
      -> scale = 1/sqrt(1+eps), shift = 0.
    """
    dims = [(input_dim, H1), (H1, H2), (H2, H3), (H3, HOUT)]
    gain = math.sqrt(2.0)
    params = []
    for idx, (fan_in, fan_out) in enumerate(dims):
        key, kw, kb = jax.random.split(key, 3)
        std = gain / math.sqrt(fan_in)
        w = (std * jax.random.normal(kw, (fan_in, fan_out))).astype(jnp.float32)
        bound = 1.0 / math.sqrt(fan_in)
        b = jax.random.uniform(kb, (1, fan_out), minval=-bound,
                               maxval=bound).astype(jnp.float32)
        params += [w, b]
        if idx < 3:  # BN after the first three Linears
            params.append(jnp.full((1, fan_out),
                                   1.0 / math.sqrt(1.0 + BN_EPS), jnp.float32))
            params.append(jnp.zeros((1, fan_out), jnp.float32))
    return tuple(params)


def tlmlp_reference(x, params):
    """Original (unfolded) eval-mode semantics."""
    (w1, b1, s1, t1, w2, b2, s2, t2, w3, b3, s3, t3, w4, b4) = params
    h = _leaky_relu((x @ w1 + b1) * s1 + t1)
    h = _leaky_relu((h @ w2 + b2) * s2 + t2)
    h = _leaky_relu((h @ w3 + b3) * s3 + t3)
    return h @ w4 + b4


def tlmlp_reference_folded(x, params, compute_dtype=jnp.float32):
    """Same op sequence / dtypes as the kernel, in plain JAX."""
    w1, t1, w2, t2, w3, t3, w4r, b4 = fold_params(params, compute_dtype)
    h = x.astype(compute_dtype)
    h = _leaky_relu(jnp.dot(h, w1, preferred_element_type=jnp.float32) + t1)
    h = _leaky_relu(jnp.dot(h.astype(compute_dtype), w2,
                            preferred_element_type=jnp.float32) + t2)
    h = _leaky_relu(jnp.dot(h.astype(compute_dtype), w3,
                            preferred_element_type=jnp.float32) + t3)
    return jnp.sum(h * w4r, axis=-1, keepdims=True) + b4


# ----------------------------------------------------------------------------
if __name__ == "__main__":
    input_dim = 32
    key = jax.random.PRNGKey(0)
    key, kx = jax.random.split(key)
    params = init_params(key, input_dim)

    # Case 1: batch divisible by the tile, grid length 2 (exercises tiling).
    x = jax.random.normal(kx, (256, input_dim), dtype=jnp.float32)
    y = jax.block_until_ready(tlmlp_forward(x, params, tb=128))
    np.testing.assert_allclose(np.asarray(y),
                               np.asarray(tlmlp_reference_folded(x, params)),
                               rtol=1e-5, atol=1e-5)
    np.testing.assert_allclose(np.asarray(y),
                               np.asarray(tlmlp_reference(x, params)),
                               rtol=1e-4, atol=1e-4)

    # Case 2: ragged batch (padded in the wrapper) with the default tile.
    x2 = jax.random.normal(jax.random.PRNGKey(1), (100, input_dim),
                           dtype=jnp.float32)
    y2 = jax.block_until_ready(tlmlp_forward(x2, params))
    np.testing.assert_allclose(np.asarray(y2),
                               np.asarray(tlmlp_reference_folded(x2, params)),
                               rtol=1e-5, atol=1e-5)

    # Case 3: bf16 matmul operands (v6e/v7x fast path), f32 accumulation.
    y3 = jax.block_until_ready(
        tlmlp_forward(x, params, tb=128, compute_dtype=jnp.bfloat16))
    np.testing.assert_allclose(
        np.asarray(y3),
        np.asarray(tlmlp_reference_folded(x, params,
                                          compute_dtype=jnp.bfloat16)),
        rtol=2e-2, atol=2e-2)

    assert y.shape == (256, 1) and y2.shape == (100, 1) and y3.shape == (256, 1)
    print("KERNEL_OK")
</pallas_src>

<mosaic_0001>
module attributes {stable_mosaic.version = 11 : i64} {
  func.func @tlmlp_kernel(%arg0: i32, %arg1: memref<128x32xf32, #tpu.memory_space<vmem>>, %arg2: memref<32x256xf32, #tpu.memory_space<vmem>>, %arg3: memref<1x256xf32, #tpu.memory_space<vmem>>, %arg4: memref<256x128xf32, #tpu.memory_space<vmem>>, %arg5: memref<1x128xf32, #tpu.memory_space<vmem>>, %arg6: memref<128x64xf32, #tpu.memory_space<vmem>>, %arg7: memref<1x64xf32, #tpu.memory_space<vmem>>, %arg8: memref<1x64xf32, #tpu.memory_space<vmem>>, %arg9: memref<1x1xf32, #tpu.memory_space<vmem>>, %arg10: memref<128x1xf32, #tpu.memory_space<vmem>>) attributes {dimension_semantics = [#tpu.dimension_semantics<parallel>], iteration_bounds = array<i64: 2>, scalar_prefetch = 0 : i64, scratch_operands = 0 : i64, tpu.core_type = #tpu.core_type<tc>, window_params = [{transform_indices = @transform_0, window_bounds = array<i64: 128, 32>}, {pipeline_mode = #tpu.pipeline_mode<synchronous>, transform_indices = @transform_1, window_bounds = array<i64: 32, 256>}, {pipeline_mode = #tpu.pipeline_mode<synchronous>, transform_indices = @transform_2, window_bounds = array<i64: 1, 256>}, {pipeline_mode = #tpu.pipeline_mode<synchronous>, transform_indices = @transform_3, window_bounds = array<i64: 256, 128>}, {pipeline_mode = #tpu.pipeline_mode<synchronous>, transform_indices = @transform_4, window_bounds = array<i64: 1, 128>}, {pipeline_mode = #tpu.pipeline_mode<synchronous>, transform_indices = @transform_5, window_bounds = array<i64: 128, 64>}, {pipeline_mode = #tpu.pipeline_mode<synchronous>, transform_indices = @transform_6, window_bounds = array<i64: 1, 64>}, {pipeline_mode = #tpu.pipeline_mode<synchronous>, transform_indices = @transform_7, window_bounds = array<i64: 1, 64>}, {pipeline_mode = #tpu.pipeline_mode<synchronous>, transform_indices = @transform_8, window_bounds = array<i64: 1, 1>}, {transform_indices = @transform_9, window_bounds = array<i64: 128, 1>}]} {
    %c0 = arith.constant 0 : index
    %c0_0 = arith.constant 0 : index
    %0 = vector.load %arg1[%c0, %c0_0] : memref<128x32xf32, #tpu.memory_space<vmem>>, vector<128x32xf32>
    %c0_1 = arith.constant 0 : index
    %c0_2 = arith.constant 0 : index
    %1 = vector.load %arg2[%c0_1, %c0_2] : memref<32x256xf32, #tpu.memory_space<vmem>>, vector<32x256xf32>
    %cst = arith.constant dense<0.000000e+00> : vector<128x256xf32>
    %2 = tpu.matmul %0, %1, %cst {dimension_numbers = #tpu.dot_dimension_numbers<[1], [0], [0], [1], [0, 0, 1, 1], [], []>} : vector<128x32xf32>, vector<32x256xf32>, vector<128x256xf32> -> vector<128x256xf32>
    %c0_3 = arith.constant 0 : index
    %c0_4 = arith.constant 0 : index
    %3 = vector.load %arg3[%c0_3, %c0_4] : memref<1x256xf32, #tpu.memory_space<vmem>>, vector<1x256xf32>
    %4 = vector.broadcast %3 : vector<1x256xf32> to vector<128x256xf32>
    %5 = arith.addf %2, %4 : vector<128x256xf32>
    %cst_5 = arith.constant 0.000000e+00 : f32
    %6 = vector.broadcast %cst_5 : f32 to vector<128x256xf32>
    %7 = arith.cmpf ogt, %5, %6 : vector<128x256xf32>
    %cst_6 = arith.constant 1.000000e-01 : f32
    %8 = vector.broadcast %cst_6 : f32 to vector<128x256xf32>
    %9 = arith.mulf %8, %5 : vector<128x256xf32>
    %10 = arith.select %7, %5, %9 : vector<128x256xi1>, vector<128x256xf32>
    %c0_7 = arith.constant 0 : index
    %c0_8 = arith.constant 0 : index
    %11 = vector.load %arg4[%c0_7, %c0_8] : memref<256x128xf32, #tpu.memory_space<vmem>>, vector<256x128xf32>
    %cst_9 = arith.constant dense<0.000000e+00> : vector<128x128xf32>
    %12 = tpu.matmul %10, %11, %cst_9 {dimension_numbers = #tpu.dot_dimension_numbers<[1], [0], [0], [1], [0, 0, 1, 1], [], []>} : vector<128x256xf32>, vector<256x128xf32>, vector<128x128xf32> -> vector<128x128xf32>
    %c0_10 = arith.constant 0 : index
    %c0_11 = arith.constant 0 : index
    %13 = vector.load %arg5[%c0_10, %c0_11] : memref<1x128xf32, #tpu.memory_space<vmem>>, vector<1x128xf32>
    %14 = vector.broadcast %13 : vector<1x128xf32> to vector<128x128xf32>
    %15 = arith.addf %12, %14 : vector<128x128xf32>
    %cst_12 = arith.constant 0.000000e+00 : f32
    %16 = vector.broadcast %cst_12 : f32 to vector<128x128xf32>
    %17 = arith.cmpf ogt, %15, %16 : vector<128x128xf32>
    %cst_13 = arith.constant 1.000000e-01 : f32
    %18 = vector.broadcast %cst_13 : f32 to vector<128x128xf32>
    %19 = arith.mulf %18, %15 : vector<128x128xf32>
    %20 = arith.select %17, %15, %19 : vector<128x128xi1>, vector<128x128xf32>
    %c0_14 = arith.constant 0 : index
    %c0_15 = arith.constant 0 : index
    %21 = vector.load %arg6[%c0_14, %c0_15] : memref<128x64xf32, #tpu.memory_space<vmem>>, vector<128x64xf32>
    %cst_16 = arith.constant dense<0.000000e+00> : vector<128x64xf32>
    %22 = tpu.matmul %20, %21, %cst_16 {dimension_numbers = #tpu.dot_dimension_numbers<[1], [0], [0], [1], [0, 0, 1, 1], [], []>} : vector<128x128xf32>, vector<128x64xf32>, vector<128x64xf32> -> vector<128x64xf32>
    %c0_17 = arith.constant 0 : index
    %c0_18 = arith.constant 0 : index
    %23 = vector.load %arg7[%c0_17, %c0_18] : memref<1x64xf32, #tpu.memory_space<vmem>>, vector<1x64xf32>
    %24 = vector.broadcast %23 : vector<1x64xf32> to vector<128x64xf32>
    %25 = arith.addf %22, %24 : vector<128x64xf32>
    %cst_19 = arith.constant 0.000000e+00 : f32
    %26 = vector.broadcast %cst_19 : f32 to vector<128x64xf32>
    %27 = arith.cmpf ogt, %25, %26 : vector<128x64xf32>
    %cst_20 = arith.constant 1.000000e-01 : f32
    %28 = vector.broadcast %cst_20 : f32 to vector<128x64xf32>
    %29 = arith.mulf %28, %25 : vector<128x64xf32>
    %30 = arith.select %27, %25, %29 : vector<128x64xi1>, vector<128x64xf32>
    %c0_21 = arith.constant 0 : index
    %c0_22 = arith.constant 0 : index
    %31 = vector.load %arg8[%c0_21, %c0_22] : memref<1x64xf32, #tpu.memory_space<vmem>>, vector<1x64xf32>
    %32 = vector.broadcast %31 : vector<1x64xf32> to vector<128x64xf32>
    %33 = arith.mulf %30, %32 : vector<128x64xf32>
    %cst_23 = arith.constant dense<0.000000e+00> : vector<128xf32>
    %34 = vector.multi_reduction <add>, %33, %cst_23 [1] : vector<128x64xf32> to vector<128xf32>
    %35 = vector.shape_cast %34 : vector<128xf32> to vector<128x1xf32>
    %c0_24 = arith.constant 0 : index
    %c0_25 = arith.constant 0 : index
    %36 = vector.load %arg9[%c0_24, %c0_25] : memref<1x1xf32, #tpu.memory_space<vmem>>, vector<1x1xf32>
    %37 = vector.broadcast %36 : vector<1x1xf32> to vector<128x1xf32>
    %38 = arith.addf %35, %37 : vector<128x1xf32>
    %c0_26 = arith.constant 0 : index
    %c0_27 = arith.constant 0 : index
    %39 = vector.load %arg10[%c0_26, %c0_27] : memref<128x1xf32, #tpu.memory_space<vmem>>, vector<128x1xf32>
    tpu.vector_store %arg10[%c0_26, %c0_27], %38 {strides = array<i32>} : memref<128x1xf32, #tpu.memory_space<vmem>>, vector<128x1xf32>,
    return
  }
  func.func @transform_0(%arg0: i32) -> (i32, i32) {
    %c0_i32 = arith.constant 0 : i32
    %c0_i32_0 = arith.constant 0 : i32
    return %arg0, %c0_i32 : i32, i32
  }
  func.func @transform_1(%arg0: i32) -> (i32, i32) {
    %c0_i32 = arith.constant 0 : i32
    %c0_i32_0 = arith.constant 0 : i32
    %c0_i32_1 = arith.constant 0 : i32
    return %c0_i32, %c0_i32_0 : i32, i32
  }
  func.func @transform_2(%arg0: i32) -> (i32, i32) {
    %c0_i32 = arith.constant 0 : i32
    %c0_i32_0 = arith.constant 0 : i32
    %c0_i32_1 = arith.constant 0 : i32
    return %c0_i32, %c0_i32_0 : i32, i32
  }
  func.func @transform_3(%arg0: i32) -> (i32, i32) {
    %c0_i32 = arith.constant 0 : i32
    %c0_i32_0 = arith.constant 0 : i32
    %c0_i32_1 = arith.constant 0 : i32
    return %c0_i32, %c0_i32_0 : i32, i32
  }
  func.func @transform_4(%arg0: i32) -> (i32, i32) {
    %c0_i32 = arith.constant 0 : i32
    %c0_i32_0 = arith.constant 0 : i32
    %c0_i32_1 = arith.constant 0 : i32
    return %c0_i32, %c0_i32_0 : i32, i32
  }
  func.func @transform_5(%arg0: i32) -> (i32, i32) {
    %c0_i32 = arith.constant 0 : i32
    %c0_i32_0 = arith.constant 0 : i32
    %c0_i32_1 = arith.constant 0 : i32
    return %c0_i32, %c0_i32_0 : i32, i32
  }
  func.func @transform_6(%arg0: i32) -> (i32, i32) {
    %c0_i32 = arith.constant 0 : i32
    %c0_i32_0 = arith.constant 0 : i32
    %c0_i32_1 = arith.constant 0 : i32
    return %c0_i32, %c0_i32_0 : i32, i32
  }
  func.func @transform_7(%arg0: i32) -> (i32, i32) {
    %c0_i32 = arith.constant 0 : i32
    %c0_i32_0 = arith.constant 0 : i32
    %c0_i32_1 = arith.constant 0 : i32
    return %c0_i32, %c0_i32_0 : i32, i32
  }
  func.func @transform_8(%arg0: i32) -> (i32, i32) {
    %c0_i32 = arith.constant 0 : i32
    %c0_i32_0 = arith.constant 0 : i32
    %c0_i32_1 = arith.constant 0 : i32
    return %c0_i32, %c0_i32_0 : i32, i32
  }
  func.func @transform_9(%arg0: i32) -> (i32, i32) {
    %c0_i32 = arith.constant 0 : i32
    %c0_i32_0 = arith.constant 0 : i32
    return %arg0, %c0_i32 : i32, i32
  }
}

</mosaic_0001>

<bundles_post_ra>
// kernel: tpu_custom_call.1
= control target key start
LH: loop header
LB: loop body
LE: loop exit
PB: predicated region body
PF: predicated region fallthrough
CT: control target
= control target key end

     0   :  { %s1598_s11 = smov 0   ;;  %s2040_s0 = inlined_call_operand.vmem [shape: f32[256,32], index: 0, kind: input, shape index: {}]   ;;  %s2041_s1 = inlined_call_operand.vmem [shape: f32[32,256], index: 1, kind: input, shape index: {}]   ;;  %s2042_s2 = inlined_call_operand.vmem [shape: f32[1,256], index: 2, kind: input, shape index: {}]   ;;  %s2043_s3 = inlined_call_operand.vmem [shape: f32[256,128], index: 3, kind: input, shape index: {}]   ;;  %s2044_s4 = inlined_call_operand.vmem [shape: f32[1,128], index: 4, kind: input, shape index: {}]   ;;  %s2045_s5 = inlined_call_operand.vmem [shape: f32[128,64], index: 5, kind: input, shape index: {}]   ;;  %s2046_s6 = inlined_call_operand.vmem [shape: f32[1,64], index: 6, kind: input, shape index: {}]   ;;  %s2047_s7 = inlined_call_operand.vmem [shape: f32[1,64], index: 7, kind: input, shape index: {}]   ;;  %s2048_s8 = inlined_call_operand.<no memory space> [shape: f32[1,1], index: 8, kind: input, shape index: {}]   ;;  %s2049_s9 = inlined_call_operand.vmem [shape: f32[256,1], index: 9, kind: output, shape index: {}]  }
   0x1   :  { %v14_v0 = vstv %s2048_s8 }
   0x2   :  { %15 = vst [vmem:[#allocation2] sm:$0x1] %v14_v0 }
   0x3 LB: > { %s1296_s12 = sadd.s32 4294967295, %s1542_s11   ;;  %p1300_p0 = scmp.ge.s32.totalorder %s1542_s11, 1  ;;  %s1542_s11 = sphi %s1598_s11, %s21_s11  }
   0x4   : > { %p290_p1 = scmp.lt.s32.totalorder %s1542_s11, 3 }
   0x6   : > { %p291_p2 = pnand %p1300_p0, %p290_p1 }
   0x7   : > { %s1301_s18 = sshll.u32 (!%p291_p2), %s1296_s12, 4 }
   0x8   : > { %294 = sbr.rel (%p291_p2) target bundleno = 829 (0x33d), region = 56  ;;  %p327_p3 = scmp.lt.s32.totalorder (!%p291_p2), %s1301_s18, 31 }
   0xd   : > { %v361_v1 = vld [vmem:[%s2041_s1 + $0x38] sm:$0xff]  ;;  %v360_v2 = vld [vmem:[%s2041_s1 + $0x30] sm:$0xff]  ;;  %v359_v3 = vld [vmem:[%s2041_s1 + $0x28] sm:$0xff]  ;;  %v1544_v5 = vmov 0.0   ;;  %s2051_s18 = smov (!%p327_p3, %s1301_s18), 31  ;;  %vm374_vm0 = vcmask 261120  }
   0xe   : > { %447 = vmatprep.subr.mxu0 %v361_v1  ;;  %v358_v4 = vld [vmem:[%s2041_s1 + $0x20] sm:$0xff]  ;;  %487 = vmatprep.mubr.f32.mxu0 %v1544_v5  ;;  %v357_v6 = vld [vmem:[%s2041_s1 + $0x18] sm:$0xff]  ;;  %v356_v7 = vld [vmem:[%s2041_s1 + $0x10] sm:$0xff]  ;;  %s1302_s19 = sshll.u32 %s2051_s18, 3 }
   0xf   : > { %448 = vmatpush1.msra.mxu0 %v360_v2  ;;  %v711_v8 = vld [vmem:[%s2043_s3 + $0xf8] sm:$0xff]  ;;  %v710_v10 = vld [vmem:[%s2043_s3 + $0xf0] sm:$0xff]  ;;  %v355_v12 = vld [vmem:[%s2041_s1 + $0x8] sm:$0xff]  ;;  %s1657_s24 = scalar_lea.vmem %s2040_s0, %s1302_s19  ;;  %s2003_s26 = scalar_lea.vmem %s2049_s9, %s1302_s19 }
  0x10   : > { %449 = vmatprep.subr.mxu0 %v359_v3  ;;  %1327 = vmatprep.subr.mxu1 %v711_v8  ;;  %v695_v9 = vld [vmem:[%s2043_s3 + $0x78] sm:$0xff]  ;;  %v694_v11 = vld [vmem:[%s2043_s3 + $0x70] sm:$0xff]  ;;  %v709_v13 = vld [vmem:[%s2043_s3 + $0xe8] sm:$0xff]  ;;  %v364_v3 = vlaneseq }
  0x11   : > { %450 = vmatpush1.msra.mxu0 %v358_v4  ;;  %1328 = vmatpush3.msra.mxu1 %v695_v9  ;;  %v354_v14 = vld [vmem:[%s2041_s1] sm:$0xff]  ;;  %v693_v15 = vld [vmem:[%s2043_s3 + $0x68] sm:$0xff]  ;;  %v707_v19 = vld [vmem:[%s2043_s3 + $0xd8] sm:$0xff] }
  0x12   : > { %451 = vmatprep.subr.mxu0 %v357_v6  ;;  %1329 = vmatprep.subr.mxu1 %v710_v10  ;;  %v708_v16 = vld [vmem:[%s2043_s3 + $0xe0] sm:$0xff]  ;;  %v691_v20 = vld [vmem:[%s2043_s3 + $0x58] sm:$0xff]  ;;  %v339_v21 = vld [vmem:[%s1657_s24 + $0x8] sm:$0xff]  ;;  %v365_v4 = vshrl.u32 %v364_v3, 7 }
  0x13   : > { %452 = vmatpush1.msra.mxu0 %v356_v7  ;;  %1330 = vmatpush3.msra.mxu1 %v694_v11  ;;  %v338_v17 = vld [vmem:[%s1657_s24] sm:$0xff]  ;;  %v706_v22 = vld [vmem:[%s2043_s3 + $0xd0] sm:$0xff]  ;;  %v705_v24 = vld [vmem:[%s2043_s3 + $0xc8] sm:$0xff] }
  0x14   : > { %453 = vmatprep.subr.mxu0 %v355_v12  ;;  %1331 = vmatprep.subr.mxu1 %v709_v13  ;;  %v692_v18 = vld [vmem:[%s2043_s3 + $0x60] sm:$0xff]  ;;  %v690_v23 = vld [vmem:[%s2043_s3 + $0x50] sm:$0xff]  ;;  %v689_v25 = vld [vmem:[%s2043_s3 + $0x48] sm:$0xff]  ;;  %v370_v7 = vsub.s32 1, %v365_v4 }
  0x15   : > { %454 = vmatpush1.msra.mxu0 %v354_v14  ;;  %1332 = vmatpush3.msra.mxu1 %v693_v15  ;;  %v340_v26 = vld [vmem:[%s1657_s24 + $0x10] sm:$0xff]  ;;  %v704_v27 = vld [vmem:[%s2043_s3 + $0xc0] sm:$0xff]  ;;  %v703_v29 = vld [vmem:[%s2043_s3 + $0xb8] sm:$0xff] }
  0x16   : > { %1305 = vmatmul.mubr.msk.f32.vlgmr.msra.gmra.mxu0 %vm374_vm0, %v338_v17  ;;  %1333 = vmatprep.subr.mxu1 %v708_v16  ;;  %v688_v28 = vld [vmem:[%s2043_s3 + $0x40] sm:$0xff]  ;;  %v687_v30 = vld [vmem:[%s2043_s3 + $0x38] sm:$0xff]  ;;  %v702_v32 = vld [vmem:[%s2043_s3 + $0xb0] sm:$0xff] }
  0x17   : > { %493 = vmatprep.mubr.f32.mxu0 %v1544_v5  ;;  %1334 = vmatpush3.msra.mxu1 %v692_v18  ;;  %v341_v31 = vld [vmem:[%s1657_s24 + $0x18] sm:$0xff]  ;;  %v686_v33 = vld [vmem:[%s2043_s3 + $0x30] sm:$0xff]  ;;  %v701_v34 = vld [vmem:[%s2043_s3 + $0xa8] sm:$0xff] }
  0x18   : > { %1335 = vmatprep.subr.mxu1 %v707_v19  ;;  %v685_v35 = vld [vmem:[%s2043_s3 + $0x28] sm:$0xff]  ;;  %v342_v36 = vld [vmem:[%s1657_s24 + $0x20] sm:$0xff]  ;;  %v344_v39 = vld [vmem:[%s1657_s24 + $0x30] sm:$0xff] }
  0x19   : > { %1336 = vmatpush3.msra.mxu1 %v691_v20  ;;  %v700_v37 = vld [vmem:[%s2043_s3 + $0xa0] sm:$0xff]  ;;  %v343_v38 = vld [vmem:[%s1657_s24 + $0x28] sm:$0xff]  ;;  %v345_v40 = vld [vmem:[%s1657_s24 + $0x38] sm:$0xff] }
  0x1a   : > { %1306 = vmatmul.mubr.msk.f32.gmra.mxu0 %vm374_vm0, %v339_v21  ;;  %1337 = vmatprep.subr.mxu1 %v706_v22  ;;  %v346_v41 = vld [vmem:[%s1657_s24 + $0x40] sm:$0xff]  ;;  %v347_v42 = vld [vmem:[%s1657_s24 + $0x48] sm:$0xff]  ;;  %v348_v43 = vld [vmem:[%s1657_s24 + $0x50] sm:$0xff] }
  0x1b   : > { %499 = vmatprep.mubr.f32.mxu0 %v1544_v5  ;;  %1338 = vmatpush3.msra.mxu1 %v690_v23  ;;  %v349_v44 = vld [vmem:[%s1657_s24 + $0x58] sm:$0xff]  ;;  %v350_v45 = vld [vmem:[%s1657_s24 + $0x60] sm:$0xff]  ;;  %v351_v46 = vld [vmem:[%s1657_s24 + $0x68] sm:$0xff] }
  0x1c   : > { %1339 = vmatprep.subr.mxu1 %v705_v24  ;;  %v352_v47 = vld [vmem:[%s1657_s24 + $0x70] sm:$0xff]  ;;  %v353_v48 = vld [vmem:[%s1657_s24 + $0x78] sm:$0xff]  ;;  %v684_v49 = vld [vmem:[%s2043_s3 + $0x20] sm:$0xff] }
  0x1d   : > { %1340 = vmatpush3.msra.mxu1 %v689_v25  ;;  %v699_v50 = vld [vmem:[%s2043_s3 + $0x98] sm:$0xff]  ;;  %v698_v52 = vld [vmem:[%s2043_s3 + $0x90] sm:$0xff]  ;;  %v697_v54 = vld [vmem:[%s2043_s3 + $0x88] sm:$0xff] }
  0x1e   : > { %1307 = vmatmul.mubr.msk.f32.gmra.mxu0 %vm374_vm0, %v340_v26  ;;  %1341 = vmatprep.subr.mxu1 %v704_v27  ;;  %v683_v51 = vld [vmem:[%s2043_s3 + $0x18] sm:$0xff]  ;;  %v682_v53 = vld [vmem:[%s2043_s3 + $0x10] sm:$0xff]  ;;  %v681_v55 = vld [vmem:[%s2043_s3 + $0x8] sm:$0xff] }
  0x1f   : > { %505 = vmatprep.mubr.f32.mxu0 %v1544_v5  ;;  %1342 = vmatpush3.msra.mxu1 %v688_v28  ;;  %v696_v56 = vld [vmem:[%s2043_s3 + $0x80] sm:$0xff]  ;;  %v927_v58 = vld [vmem:[%s2045_s5 + $0x78] sm:$0xff]  ;;  %v1790_v59 = vld [vmem:[%s2045_s5 + $0x70] sm:$0xff] }
  0x20   : > { %1343 = vmatprep.subr.mxu1 %v703_v29  ;;  %v680_v57 = vld [vmem:[%s2043_s3] sm:$0xff]  ;;  %1439 = vmatprep.subr.mxu0 %v927_v58  ;;  %v1795_v60 = vld [vmem:[%s2045_s5 + $0x68] sm:$0xff]  ;;  %v1809_v62 = vld [vmem:[%s2045_s5 + $0x58] sm:$0xff] }
  0x21   : > { %1344 = vmatpush3.msra.mxu1 %v687_v30  ;;  %1440 = vmatpush3.msra.mxu0 %v927_v58  ;;  %v1802_v61 = vld [vmem:[%s2045_s5 + $0x60] sm:$0xff]  ;;  %v1816_v63 = vld [vmem:[%s2045_s5 + $0x50] sm:$0xff]  ;;  %v1823_v0 = vld [vmem:[%s2045_s5 + $0x48] sm:$0xff] }
  0x22   : > { %1308 = vmatmul.mubr.msk.f32.gmra.mxu0 %vm374_vm0, %v341_v31  ;;  %1345 = vmatprep.subr.mxu1 %v702_v32  ;;  %v1830_v1 = vld [vmem:[%s2045_s5 + $0x40] sm:$0xff]  ;;  %v1837_v2 = vld [vmem:[%s2045_s5 + $0x38] sm:$0xff] }
  0x23   : > { %511 = vmatprep.mubr.f32.mxu0 %v1544_v5  ;;  %1346 = vmatpush3.msra.mxu1 %v686_v33  ;;  %v362_v6 = vld [vmem:[%s2042_s2] sm:$0x3] }
  0x24   : > { %1347 = vmatprep.subr.mxu1 %v701_v34  ;;  %1441 = vmatprep.subr.mxu0 %v1790_v59  ;;  %v1848_v9 = vrot.slane %v362_v6, %v370_v7 }
  0x25   : > { %1348 = vmatpush3.msra.mxu1 %v685_v35  ;;  %1442 = vmatpush3.msra.mxu0 %v1790_v59 }
  0x26   : > { %1309 = vmatmul.mubr.msk.f32.gmra.mxu0 %vm374_vm0, %v342_v36  ;;  %1349 = vmatprep.subr.mxu1 %v700_v37 }
  0x27   : > { %517 = vmatprep.mubr.f32.mxu0 %v1544_v5  ;;  %1350 = vmatpush3.msra.mxu1 %v684_v49 }
  0x28   : > { %1351 = vmatprep.subr.mxu1 %v699_v50  ;;  %1443 = vmatprep.subr.mxu0 %v1795_v60 }
  0x29   : > { %1352 = vmatpush3.msra.mxu1 %v683_v51  ;;  %1444 = vmatpush3.msra.mxu0 %v1795_v60 }
  0x2a   : > { %1310 = vmatmul.mubr.msk.f32.gmra.mxu0 %vm374_vm0, %v343_v38  ;;  %1353 = vmatprep.subr.mxu1 %v698_v52 }
  0x2b   : > { %523 = vmatprep.mubr.f32.mxu0 %v1544_v5  ;;  %1354 = vmatpush3.msra.mxu1 %v682_v53 }
  0x2c   : > { %1355 = vmatprep.subr.mxu1 %v697_v54  ;;  %1445 = vmatprep.subr.mxu0 %v1802_v61 }
  0x2d   : > { %1356 = vmatpush3.msra.mxu1 %v681_v55  ;;  %1446 = vmatpush3.msra.mxu0 %v1802_v61 }
  0x2e   : > { %1311 = vmatmul.mubr.msk.f32.gmra.mxu0 %vm374_vm0, %v344_v39  ;;  %1357 = vmatprep.subr.mxu1 %v696_v56 }
  0x2f   : > { %529 = vmatprep.mubr.f32.mxu0 %v1544_v5  ;;  %1358 = vmatpush3.msra.mxu1 %v680_v57 }
  0x30   : > { %1495 = vmatprep.subr.mxu1 %v927_v58  ;;  %1447 = vmatprep.subr.mxu0 %v1809_v62 }
  0x31   : > { %1448 = vmatpush3.msra.mxu0 %v1809_v62 }
  0x32   : > { %1312 = vmatmul.mubr.msk.f32.gmra.mxu0 %vm374_vm0, %v345_v40  ;;  %1449 = vmatprep.subr.mxu0 %v1816_v63 }
  0x33   : > { %535 = vmatprep.mubr.f32.mxu0 %v1544_v5  ;;  %1450 = vmatpush3.msra.mxu0 %v1816_v63 }
  0x34   : > { %1451 = vmatprep.subr.mxu0 %v1823_v0 }
  0x35   : > { %1452 = vmatpush3.msra.mxu0 %v1823_v0 }
  0x36   : > { %1313 = vmatmul.mubr.msk.f32.gmra.mxu0 %vm374_vm0, %v346_v41  ;;  %1453 = vmatprep.subr.mxu0 %v1830_v1 }
  0x37   : > { %541 = vmatprep.mubr.f32.mxu0 %v1544_v5  ;;  %1454 = vmatpush3.msra.mxu0 %v1830_v1 }
  0x38   : > { %1455 = vmatprep.subr.mxu0 %v1837_v2 }
  0x39   : > { %1456 = vmatpush3.msra.mxu0 %v1837_v2 }
  0x3a   : > { %1314 = vmatmul.mubr.msk.f32.gmra.mxu0 %vm374_vm0, %v347_v42 }
  0x3b   : > { %547 = vmatprep.mubr.f32.mxu0 %v1544_v5 }
  0x3e   : > { %1315 = vmatmul.mubr.msk.f32.gmra.mxu0 %vm374_vm0, %v348_v43 }
  0x3f   : > { %553 = vmatprep.mubr.f32.mxu0 %v1544_v5 }
  0x42   : > { %1316 = vmatmul.mubr.msk.f32.gmra.mxu0 %vm374_vm0, %v349_v44 }
  0x43   : > { %559 = vmatprep.mubr.f32.mxu0 %v1544_v5 }
  0x46   : > { %1317 = vmatmul.mubr.msk.f32.gmra.mxu0 %vm374_vm0, %v350_v45 }
  0x47   : > { %565 = vmatprep.mubr.f32.mxu0 %v1544_v5 }
  0x4a   : > { %1318 = vmatmul.mubr.msk.f32.gmra.mxu0 %vm374_vm0, %v351_v46 }
  0x4b   : > { %571 = vmatprep.mubr.f32.mxu0 %v1544_v5 }
  0x4e   : > { %1319 = vmatmul.mubr.msk.f32.gmra.mxu0 %vm374_vm0, %v352_v47 }
  0x4f   : > { %577 = vmatprep.mubr.f32.mxu0 %v1544_v5  ;;  %v366_v5 = vsub.s32 0, %v365_v4 }
  0x51   : > { %v1846_v8 = vrot.slane %v362_v6, %v366_v5 }
  0x52   : > { %1320 = vmatmul.mubr.msk.f32.gmra.mxu0 %vm374_vm0, %v353_v48 }
  0xd6   : > { %v489_v10 = vpop.f32.mrf.mxu0 }
  0xd7   : > { %v490_v11 = vadd.f32 %v489_v10, %v1846_v8 }
  0xd8   : > { %v491_v12 = vpop.f32.mrf.mxu0 }
  0xd9   : > { %v492_v13 = vadd.f32 %v491_v12, %v1848_v9  ;;  %v616_v14 = vmul.f32 0.1, %v490_v11  ;;  %vm584_vm2 = vcmp.gt.f32.partialorder %v490_v11, 0.0 }
  0xda   : > { %v495_v15 = vpop.f32.mrf.mxu0 }
  0xdb   : > { %v496_v16 = vadd.f32 %v495_v15, %v1846_v8  ;;  %vm585_vm1 = vcmp.gt.f32.partialorder %v492_v13, 0.0  ;;  %v617_v17 = vmul.f32 0.1, %v492_v13  ;;  %v648_v23 = vsel %vm584_vm2, %v490_v11, %v616_v14 }
  0xdc   : > { %v497_v18 = vpop.f32.mrf.mxu0 }
  0xdd   : > { %v498_v19 = vadd.f32 %v497_v18, %v1848_v9  ;;  %v649_v20 = vsel %vm585_vm1, %v492_v13, %v617_v17  ;;  %v618_v21 = vmul.f32 0.1, %v496_v16  ;;  %vm586_vm4 = vcmp.gt.f32.partialorder %v496_v16, 0.0 }
  0xde   : > { %v501_v22 = vpop.f32.mrf.mxu0  ;;  %783 = vmatprep.mubr.f32.mxu1 %v649_v20 }
  0xdf   : > { %v619_v24 = vmul.f32 0.1, %v498_v19  ;;  %v502_v25 = vadd.f32 %v501_v22, %v1846_v8  ;;  %784 = vmatmul.mubr.f32.vlgmr.msra.gmra.mxu1 %v648_v23  ;;  %vm587_vm3 = vcmp.gt.f32.partialorder %v498_v19, 0.0  ;;  %v650_v31 = vsel %vm586_vm4, %v496_v16, %v618_v21 }
  0xe0   : > { %v503_v26 = vpop.f32.mrf.mxu0  ;;  %1511 = vmatpush3.msra.mxu1 %v927_v58 }
  0xe1   : > { %v504_v27 = vadd.f32 %v503_v26, %v1848_v9  ;;  %v651_v28 = vsel %vm587_vm3, %v498_v19, %v619_v24  ;;  %1496 = vmatprep.subr.mxu1 %v1790_v59  ;;  %v620_v29 = vmul.f32 0.1, %v502_v25  ;;  %vm588_vm6 = vcmp.gt.f32.partialorder %v502_v25, 0.0 }
  0xe2   : > { %v507_v30 = vpop.f32.mrf.mxu0  ;;  %788 = vmatprep.mubr.f32.mxu1 %v651_v28  ;;  %1512 = vmatpush3.msra.mxu1 %v1790_v59 }
  0xe3   : > { %v621_v32 = vmul.f32 0.1, %v504_v27  ;;  %v508_v33 = vadd.f32 %v507_v30, %v1846_v8  ;;  %789 = vmatmul.mubr.f32.gmra.mxu1 %v650_v31  ;;  %vm589_vm5 = vcmp.gt.f32.partialorder %v504_v27, 0.0  ;;  %1497 = vmatprep.subr.mxu1 %v1795_v60  ;;  %v652_v39 = vsel %vm588_vm6, %v502_v25, %v620_v29 }
  0xe4   : > { %v509_v34 = vpop.f32.mrf.mxu0  ;;  %1513 = vmatpush3.msra.mxu1 %v1795_v60 }
  0xe5   : > { %v510_v35 = vadd.f32 %v509_v34, %v1848_v9  ;;  %v653_v36 = vsel %vm589_vm5, %v504_v27, %v621_v32  ;;  %1498 = vmatprep.subr.mxu1 %v1802_v61  ;;  %v622_v37 = vmul.f32 0.1, %v508_v33  ;;  %vm590_vm8 = vcmp.gt.f32.partialorder %v508_v33, 0.0 }
  0xe6   : > { %v513_v38 = vpop.f32.mrf.mxu0  ;;  %793 = vmatprep.mubr.f32.mxu1 %v653_v36  ;;  %1514 = vmatpush3.msra.mxu1 %v1802_v61 }
  0xe7   : > { %v623_v40 = vmul.f32 0.1, %v510_v35  ;;  %v514_v41 = vadd.f32 %v513_v38, %v1846_v8  ;;  %794 = vmatmul.mubr.f32.gmra.mxu1 %v652_v39  ;;  %vm591_vm7 = vcmp.gt.f32.partialorder %v510_v35, 0.0  ;;  %1499 = vmatprep.subr.mxu1 %v1809_v62  ;;  %v654_v47 = vsel %vm590_vm8, %v508_v33, %v622_v37 }
  0xe8   : > { %v515_v42 = vpop.f32.mrf.mxu0  ;;  %1515 = vmatpush3.msra.mxu1 %v1809_v62 }
  0xe9   : > { %v516_v43 = vadd.f32 %v515_v42, %v1848_v9  ;;  %v655_v44 = vsel %vm591_vm7, %v510_v35, %v623_v40  ;;  %1500 = vmatprep.subr.mxu1 %v1816_v63  ;;  %v624_v45 = vmul.f32 0.1, %v514_v41  ;;  %vm592_vm10 = vcmp.gt.f32.partialorder %v514_v41, 0.0 }
  0xea   : > { %v519_v46 = vpop.f32.mrf.mxu0  ;;  %798 = vmatprep.mubr.f32.mxu1 %v655_v44  ;;  %1516 = vmatpush3.msra.mxu1 %v1816_v63 }
  0xeb   : > { %v625_v48 = vmul.f32 0.1, %v516_v43  ;;  %v520_v49 = vadd.f32 %v519_v46, %v1846_v8  ;;  %799 = vmatmul.mubr.f32.gmra.mxu1 %v654_v47  ;;  %vm593_vm9 = vcmp.gt.f32.partialorder %v516_v43, 0.0  ;;  %1501 = vmatprep.subr.mxu1 %v1823_v0  ;;  %v656_v55 = vsel %vm592_vm10, %v514_v41, %v624_v45 }
  0xec   : > { %v521_v50 = vpop.f32.mrf.mxu0  ;;  %1517 = vmatpush3.msra.mxu1 %v1823_v0 }
  0xed   : > { %v522_v51 = vadd.f32 %v521_v50, %v1848_v9  ;;  %v657_v52 = vsel %vm593_vm9, %v516_v43, %v625_v48  ;;  %1502 = vmatprep.subr.mxu1 %v1830_v1  ;;  %v626_v53 = vmul.f32 0.1, %v520_v49  ;;  %vm594_vm12 = vcmp.gt.f32.partialorder %v520_v49, 0.0 }
  0xee   : > { %v525_v54 = vpop.f32.mrf.mxu0  ;;  %803 = vmatprep.mubr.f32.mxu1 %v657_v52  ;;  %1518 = vmatpush3.msra.mxu1 %v1830_v1 }
  0xef   : > { %v627_v56 = vmul.f32 0.1, %v522_v51  ;;  %v526_v57 = vadd.f32 %v525_v54, %v1846_v8  ;;  %804 = vmatmul.mubr.f32.gmra.mxu1 %v656_v55  ;;  %vm595_vm11 = vcmp.gt.f32.partialorder %v522_v51, 0.0  ;;  %1503 = vmatprep.subr.mxu1 %v1837_v2  ;;  %v658_v63 = vsel %vm594_vm12, %v520_v49, %v626_v53 }
  0xf0   : > { %v527_v58 = vpop.f32.mrf.mxu0  ;;  %1519 = vmatpush3.msra.mxu1 %v1837_v2 }
  0xf1   : > { %v528_v59 = vadd.f32 %v527_v58, %v1848_v9  ;;  %v659_v60 = vsel %vm595_vm11, %v522_v51, %v627_v56  ;;  %v628_v61 = vmul.f32 0.1, %v526_v57  ;;  %vm596_vm14 = vcmp.gt.f32.partialorder %v526_v57, 0.0 }
  0xf2   : > { %v531_v62 = vpop.f32.mrf.mxu0  ;;  %808 = vmatprep.mubr.f32.mxu1 %v659_v60 }
  0xf3   : > { %v629_v0 = vmul.f32 0.1, %v528_v59  ;;  %v532_v1 = vadd.f32 %v531_v62, %v1846_v8  ;;  %809 = vmatmul.mubr.f32.gmra.mxu1 %v658_v63  ;;  %vm597_vm13 = vcmp.gt.f32.partialorder %v528_v59, 0.0  ;;  %v660_v2 = vsel %vm596_vm14, %v526_v57, %v628_v61 }
  0xf4   : > { %v533_v3 = vpop.f32.mrf.mxu0 }
  0xf5   : > { %v534_v4 = vadd.f32 %v533_v3, %v1848_v9  ;;  %v661_v5 = vsel %vm597_vm13, %v528_v59, %v629_v0  ;;  %v630_v6 = vmul.f32 0.1, %v532_v1  ;;  %vm598_vm0 = vcmp.gt.f32.partialorder %v532_v1, 0.0 }
  0xf6   : > { %v537_v7 = vpop.f32.mrf.mxu0  ;;  %813 = vmatprep.mubr.f32.mxu1 %v661_v5 }
  0xf7   : > { %v631_v10 = vmul.f32 0.1, %v534_v4  ;;  %v538_v11 = vadd.f32 %v537_v7, %v1846_v8  ;;  %814 = vmatmul.mubr.f32.gmra.mxu1 %v660_v2  ;;  %vm599_vm15 = vcmp.gt.f32.partialorder %v534_v4, 0.0  ;;  %v662_v17 = vsel %vm598_vm0, %v532_v1, %v630_v6 }
  0xf8   : > { %v539_v12 = vpop.f32.mrf.mxu0 }
  0xf9   : > { %v540_v13 = vadd.f32 %v539_v12, %v1848_v9  ;;  %v663_v14 = vsel %vm599_vm15, %v534_v4, %v631_v10  ;;  %v632_v15 = vmul.f32 0.1, %v538_v11  ;;  %vm600_vm2 = vcmp.gt.f32.partialorder %v538_v11, 0.0 }
  0xfa   : > { %v543_v16 = vpop.f32.mrf.mxu0  ;;  %818 = vmatprep.mubr.f32.mxu1 %v663_v14  ;;  %v916_v14 = vld [vmem:[%s2045_s5 + $0x20] sm:$0xff] }
  0xfb   : > { %v633_v18 = vmul.f32 0.1, %v540_v13  ;;  %v544_v19 = vadd.f32 %v543_v16, %v1846_v8  ;;  %819 = vmatmul.mubr.f32.gmra.mxu1 %v662_v17  ;;  %vm601_vm1 = vcmp.gt.f32.partialorder %v540_v13, 0.0  ;;  %v664_v25 = vsel %vm600_vm2, %v538_v11, %v632_v15  ;;  %v915_v15 = vld [vmem:[%s2045_s5 + $0x18] sm:$0xff]  ;;  %v914_v16 = vld [vmem:[%s2045_s5 + $0x10] sm:$0xff]  ;;  %v913_v17 = vld [vmem:[%s2045_s5 + $0x8] sm:$0xff] }
  0xfc   : > { %v545_v20 = vpop.f32.mrf.mxu0 }
  0xfd   : > { %v546_v21 = vadd.f32 %v545_v20, %v1848_v9  ;;  %v665_v22 = vsel %vm601_vm1, %v540_v13, %v633_v18  ;;  %v634_v23 = vmul.f32 0.1, %v544_v19  ;;  %vm602_vm4 = vcmp.gt.f32.partialorder %v544_v19, 0.0  ;;  %v912_v18 = vld [vmem:[%s2045_s5] sm:$0xff] }
  0xfe   : > { %v549_v24 = vpop.f32.mrf.mxu0  ;;  %823 = vmatprep.mubr.f32.mxu1 %v665_v22  ;;  %v1922_v20 = vld [vmem:[%s2044_s4] ss:$0 sm:$0xff] }
  0xff   : > { %v635_v26 = vmul.f32 0.1, %v546_v21  ;;  %v550_v27 = vadd.f32 %v549_v24, %v1846_v8  ;;  %824 = vmatmul.mubr.f32.gmra.mxu1 %v664_v25  ;;  %vm603_vm3 = vcmp.gt.f32.partialorder %v546_v21, 0.0  ;;  %v666_v33 = vsel %vm602_vm4, %v544_v19, %v634_v23 }
 0x100   : > { %v551_v28 = vpop.f32.mrf.mxu0 }
 0x101   : > { %v552_v29 = vadd.f32 %v551_v28, %v1848_v9  ;;  %v667_v30 = vsel %vm603_vm3, %v546_v21, %v635_v26  ;;  %v636_v31 = vmul.f32 0.1, %v550_v27  ;;  %vm604_vm6 = vcmp.gt.f32.partialorder %v550_v27, 0.0 }
 0x102   : > { %v555_v32 = vpop.f32.mrf.mxu0  ;;  %828 = vmatprep.mubr.f32.mxu1 %v667_v30 }
 0x103   : > { %v637_v34 = vmul.f32 0.1, %v552_v29  ;;  %v556_v35 = vadd.f32 %v555_v32, %v1846_v8  ;;  %829 = vmatmul.mubr.f32.gmra.mxu1 %v666_v33  ;;  %vm605_vm5 = vcmp.gt.f32.partialorder %v552_v29, 0.0  ;;  %v668_v41 = vsel %vm604_vm6, %v550_v27, %v636_v31 }
 0x104   : > { %v557_v36 = vpop.f32.mrf.mxu0 }
 0x105   : > { %v558_v37 = vadd.f32 %v557_v36, %v1848_v9  ;;  %v669_v38 = vsel %vm605_vm5, %v552_v29, %v637_v34  ;;  %v638_v39 = vmul.f32 0.1, %v556_v35  ;;  %vm606_vm8 = vcmp.gt.f32.partialorder %v556_v35, 0.0 }
 0x106   : > { %v561_v40 = vpop.f32.mrf.mxu0  ;;  %833 = vmatprep.mubr.f32.mxu1 %v669_v38 }
 0x107   : > { %v639_v42 = vmul.f32 0.1, %v558_v37  ;;  %v562_v43 = vadd.f32 %v561_v40, %v1846_v8  ;;  %834 = vmatmul.mubr.f32.gmra.mxu1 %v668_v41  ;;  %vm607_vm7 = vcmp.gt.f32.partialorder %v558_v37, 0.0  ;;  %v670_v49 = vsel %vm606_vm8, %v556_v35, %v638_v39 }
 0x108   : > { %v563_v44 = vpop.f32.mrf.mxu0 }
 0x109   : > { %v564_v45 = vadd.f32 %v563_v44, %v1848_v9  ;;  %v671_v46 = vsel %vm607_vm7, %v558_v37, %v639_v42  ;;  %v640_v47 = vmul.f32 0.1, %v562_v43  ;;  %vm608_vm10 = vcmp.gt.f32.partialorder %v562_v43, 0.0 }
 0x10a   : > { %v567_v48 = vpop.f32.mrf.mxu0  ;;  %838 = vmatprep.mubr.f32.mxu1 %v671_v46 }
 0x10b   : > { %v641_v50 = vmul.f32 0.1, %v564_v45  ;;  %v568_v51 = vadd.f32 %v567_v48, %v1846_v8  ;;  %839 = vmatmul.mubr.f32.gmra.mxu1 %v670_v49  ;;  %vm609_vm9 = vcmp.gt.f32.partialorder %v564_v45, 0.0  ;;  %v672_v57 = vsel %vm608_vm10, %v562_v43, %v640_v47 }
 0x10c   : > { %v569_v52 = vpop.f32.mrf.mxu0 }
 0x10d   : > { %v570_v53 = vadd.f32 %v569_v52, %v1848_v9  ;;  %v673_v54 = vsel %vm609_vm9, %v564_v45, %v641_v50  ;;  %v642_v55 = vmul.f32 0.1, %v568_v51  ;;  %vm610_vm12 = vcmp.gt.f32.partialorder %v568_v51, 0.0 }
 0x10e   : > { %v573_v56 = vpop.f32.mrf.mxu0  ;;  %843 = vmatprep.mubr.f32.mxu1 %v673_v54 }
 0x10f   : > { %v643_v58 = vmul.f32 0.1, %v570_v53  ;;  %v574_v59 = vadd.f32 %v573_v56, %v1846_v8  ;;  %844 = vmatmul.mubr.f32.gmra.mxu1 %v672_v57  ;;  %vm611_vm11 = vcmp.gt.f32.partialorder %v570_v53, 0.0  ;;  %v674_v1 = vsel %vm610_vm12, %v568_v51, %v642_v55 }
 0x110   : > { %v575_v60 = vpop.f32.mrf.mxu0 }
 0x111   : > { %v576_v61 = vadd.f32 %v575_v60, %v1848_v9  ;;  %v675_v62 = vsel %vm611_vm11, %v570_v53, %v643_v58  ;;  %v644_v63 = vmul.f32 0.1, %v574_v59  ;;  %vm612_vm14 = vcmp.gt.f32.partialorder %v574_v59, 0.0 }
 0x112   : > { %v579_v0 = vpop.f32.mrf.mxu0  ;;  %848 = vmatprep.mubr.f32.mxu1 %v675_v62 }
 0x113   : > { %v645_v3 = vmul.f32 0.1, %v576_v61  ;;  %v580_v4 = vadd.f32 %v579_v0, %v1846_v8  ;;  %849 = vmatmul.mubr.f32.gmra.mxu1 %v674_v1  ;;  %vm613_vm13 = vcmp.gt.f32.partialorder %v576_v61, 0.0  ;;  %v676_v10 = vsel %vm612_vm14, %v574_v59, %v644_v63  ;;  %v918_v8 = vld [vmem:[%s2045_s5 + $0x30] sm:$0xff] }
 0x114   : > { %v581_v5 = vpop.f32.mrf.mxu0  ;;  %1457 = vmatprep.subr.mxu0 %v918_v8  ;;  %1504 = vmatprep.subr.mxu1 %v918_v8 }
 0x115   : > { %v582_v6 = vadd.f32 %v581_v5, %v1848_v9  ;;  %v677_v7 = vsel %vm613_vm13, %v576_v61, %v645_v3  ;;  %v646_v2 = vmul.f32 0.1, %v580_v4  ;;  %vm614_vm0 = vcmp.gt.f32.partialorder %v580_v4, 0.0  ;;  %1458 = vmatpush3.msra.mxu0 %v918_v8  ;;  %v917_v9 = vld [vmem:[%s2045_s5 + $0x28] sm:$0xff]  ;;  %1520 = vmatpush3.msra.mxu1 %v918_v8 }
 0x116   : > { %853 = vmatprep.mubr.f32.mxu1 %v677_v7  ;;  %1459 = vmatprep.subr.mxu0 %v917_v9 }
 0x117   : > { %v647_v11 = vmul.f32 0.1, %v582_v6  ;;  %854 = vmatmul.mubr.f32.gmra.mxu1 %v676_v10  ;;  %vm615_vm15 = vcmp.gt.f32.partialorder %v582_v6, 0.0  ;;  %v678_v13 = vsel %vm614_vm0, %v580_v4, %v646_v2  ;;  %1505 = vmatprep.subr.mxu1 %v917_v9 }
 0x118   : > { %1460 = vmatpush3.msra.mxu0 %v917_v9  ;;  %1521 = vmatpush3.msra.mxu1 %v917_v9 }
 0x119   : > { %v679_v12 = vsel %vm615_vm15, %v582_v6, %v647_v11  ;;  %1461 = vmatprep.subr.mxu0 %v916_v14  ;;  %1506 = vmatprep.subr.mxu1 %v916_v14 }
 0x11a   : > { %858 = vmatprep.mubr.f32.mxu1 %v679_v12  ;;  %1462 = vmatpush3.msra.mxu0 %v916_v14 }
 0x11b   : > { %859 = vmatmul.mubr.f32.gmra.mxu1 %v678_v13  ;;  %1463 = vmatprep.subr.mxu0 %v915_v15 }
 0x11c   : > { %1522 = vmatpush3.msra.mxu1 %v916_v14  ;;  %1464 = vmatpush3.msra.mxu0 %v915_v15 }
 0x11d   : > { %1507 = vmatprep.subr.mxu1 %v915_v15  ;;  %1465 = vmatprep.subr.mxu0 %v914_v16 }
 0x11e   : > { %1523 = vmatpush3.msra.mxu1 %v915_v15  ;;  %1466 = vmatpush3.msra.mxu0 %v914_v16 }
 0x11f   : > { %1508 = vmatprep.subr.mxu1 %v914_v16  ;;  %1467 = vmatprep.subr.mxu0 %v913_v17 }
 0x120   : > { %1524 = vmatpush3.msra.mxu1 %v914_v16  ;;  %1468 = vmatpush3.msra.mxu0 %v913_v17 }
 0x121   : > { %1509 = vmatprep.subr.mxu1 %v913_v17  ;;  %1469 = vmatprep.subr.mxu0 %v912_v18 }
 0x122   : > { %1525 = vmatpush3.msra.mxu1 %v913_v17  ;;  %1470 = vmatpush3.msra.mxu0 %v912_v18 }
 0x123   : > { %1510 = vmatprep.subr.mxu1 %v912_v18 }
 0x124   : > { %1526 = vmatpush3.msra.mxu1 %v912_v18 }
 0x19f   : > { %v1359_v19 = vpop.f32.mrf.mxu1 }
 0x1a1   : > { %v1360_v21 = vpop.f32.mrf.mxu1 }
 0x1a2   : > { %v1361_v22 = vadd.f32 %v1360_v21, %v1359_v19 }
 0x1a3   : > { %v1362_v23 = vpop.f32.mrf.mxu1 }
 0x1a4   : > { %v786_v24 = vadd.f32 %v1361_v22, %v1922_v20 }
 0x1a5   : > { %v1363_v25 = vpop.f32.mrf.mxu1 }
 0x1a6   : > { %v1364_v26 = vadd.f32 %v1363_v25, %v1362_v23  ;;  %vm864_vm1 = vcmp.gt.f32.partialorder %v786_v24, 0.0  ;;  %v880_v27 = vmul.f32 0.1, %v786_v24 }
 0x1a7   : > { %v1365_v28 = vpop.f32.mrf.mxu1 }
 0x1a8   : > { %v791_v29 = vadd.f32 %v1364_v26, %v1922_v20  ;;  %v896_v30 = vsel %vm864_vm1, %v786_v24, %v880_v27 }
 0x1a9   : > { %v1366_v31 = vpop.f32.mrf.mxu1  ;;  %1471 = vmatprep.mubr.f32.mxu0 %v896_v30 }
 0x1aa   : > { %vm865_vm2 = vcmp.gt.f32.partialorder %v791_v29, 0.0  ;;  %v881_v32 = vmul.f32 0.1, %v791_v29  ;;  %v1367_v33 = vadd.f32 %v1366_v31, %v1365_v28 }
 0x1ab   : > { %v1368_v34 = vpop.f32.mrf.mxu1 }
 0x1ac   : > { %v796_v35 = vadd.f32 %v1367_v33, %v1922_v20  ;;  %v897_v36 = vsel %vm865_vm2, %v791_v29, %v881_v32 }
 0x1ad   : > { %v1369_v37 = vpop.f32.mrf.mxu1  ;;  %1472 = vmatmul.mubr.f32.vlgmr.msra.gmra.mxu0 %v897_v36 }
 0x1ae   : > { %v1370_v38 = vadd.f32 %v1369_v37, %v1368_v34  ;;  %vm866_vm3 = vcmp.gt.f32.partialorder %v796_v35, 0.0  ;;  %v882_v39 = vmul.f32 0.1, %v796_v35 }
 0x1af   : > { %v1371_v40 = vpop.f32.mrf.mxu1 }
 0x1b0   : > { %v801_v41 = vadd.f32 %v1370_v38, %v1922_v20  ;;  %v898_v42 = vsel %vm866_vm3, %v796_v35, %v882_v39  ;;  %vm1151_vm3 = vcmask 523264  }
 0x1b1   : > { %v1372_v43 = vpop.f32.mrf.mxu1  ;;  %1474 = vmatprep.mubr.f32.mxu0 %v898_v42 }
 0x1b2   : > { %v1373_v44 = vadd.f32 %v1372_v43, %v1371_v40  ;;  %vm867_vm4 = vcmp.gt.f32.partialorder %v801_v41, 0.0  ;;  %v883_v45 = vmul.f32 0.1, %v801_v41 }
 0x1b3   : > { %v1374_v46 = vpop.f32.mrf.mxu1 }
 0x1b4   : > { %v806_v47 = vadd.f32 %v1373_v44, %v1922_v20  ;;  %v899_v48 = vsel %vm867_vm4, %v801_v41, %v883_v45 }
 0x1b5   : > { %v1375_v49 = vpop.f32.mrf.mxu1  ;;  %1475 = vmatmul.mubr.f32.gmra.mxu0 %v899_v48 }
 0x1b6   : > { %v1376_v50 = vadd.f32 %v1375_v49, %v1374_v46  ;;  %vm868_vm5 = vcmp.gt.f32.partialorder %v806_v47, 0.0  ;;  %v884_v51 = vmul.f32 0.1, %v806_v47 }
 0x1b7   : > { %v1377_v52 = vpop.f32.mrf.mxu1 }
 0x1b8   : > { %v811_v53 = vadd.f32 %v1376_v50, %v1922_v20  ;;  %v900_v54 = vsel %vm868_vm5, %v806_v47, %v884_v51 }
 0x1b9   : > { %v1378_v55 = vpop.f32.mrf.mxu1  ;;  %1477 = vmatprep.mubr.f32.mxu0 %v900_v54 }
 0x1ba   : > { %v1379_v56 = vadd.f32 %v1378_v55, %v1377_v52  ;;  %vm869_vm6 = vcmp.gt.f32.partialorder %v811_v53, 0.0  ;;  %v885_v57 = vmul.f32 0.1, %v811_v53 }
 0x1bb   : > { %v1380_v58 = vpop.f32.mrf.mxu1 }
 0x1bc   : > { %v816_v59 = vadd.f32 %v1379_v56, %v1922_v20  ;;  %v901_v60 = vsel %vm869_vm6, %v811_v53, %v885_v57  ;;  %v1943_v53 = vld [vmem:[%s2046_s6] ss:$0 sm:$0xff] }
 0x1bd   : > { %v1381_v61 = vpop.f32.mrf.mxu1  ;;  %1478 = vmatmul.mubr.f32.gmra.mxu0 %v901_v60 }
 0x1be   : > { %v1382_v62 = vadd.f32 %v1381_v61, %v1380_v58  ;;  %vm870_vm7 = vcmp.gt.f32.partialorder %v816_v59, 0.0  ;;  %v886_v63 = vmul.f32 0.1, %v816_v59 }
 0x1bf   : > { %v1383_v0 = vpop.f32.mrf.mxu1 }
 0x1c0   : > { %v821_v1 = vadd.f32 %v1382_v62, %v1922_v20  ;;  %v902_v3 = vsel %vm870_vm7, %v816_v59, %v886_v63 }
 0x1c1   : > { %v1384_v4 = vpop.f32.mrf.mxu1  ;;  %1480 = vmatprep.mubr.f32.mxu0 %v902_v3 }
 0x1c2   : > { %v1385_v5 = vadd.f32 %v1384_v4, %v1383_v0  ;;  %vm871_vm8 = vcmp.gt.f32.partialorder %v821_v1, 0.0  ;;  %v887_v6 = vmul.f32 0.1, %v821_v1 }
 0x1c3   : > { %v1386_v7 = vpop.f32.mrf.mxu1 }
 0x1c4   : > { %v826_v2 = vadd.f32 %v1385_v5, %v1922_v20  ;;  %v903_v10 = vsel %vm871_vm8, %v821_v1, %v887_v6 }
 0x1c5   : > { %v1387_v11 = vpop.f32.mrf.mxu1  ;;  %1481 = vmatmul.mubr.f32.gmra.mxu0 %v903_v10 }
 0x1c6   : > { %v1388_v12 = vadd.f32 %v1387_v11, %v1386_v7  ;;  %vm872_vm9 = vcmp.gt.f32.partialorder %v826_v2, 0.0  ;;  %v888_v13 = vmul.f32 0.1, %v826_v2 }
 0x1c7   : > { %v1389_v8 = vpop.f32.mrf.mxu1 }
 0x1c8   : > { %v831_v9 = vadd.f32 %v1388_v12, %v1922_v20  ;;  %v904_v14 = vsel %vm872_vm9, %v826_v2, %v888_v13 }
 0x1c9   : > { %v1390_v15 = vpop.f32.mrf.mxu1  ;;  %1483 = vmatprep.mubr.f32.mxu0 %v904_v14 }
 0x1ca   : > { %v1391_v16 = vadd.f32 %v1390_v15, %v1389_v8  ;;  %vm873_vm10 = vcmp.gt.f32.partialorder %v831_v9, 0.0  ;;  %v889_v17 = vmul.f32 0.1, %v831_v9 }
 0x1cb   : > { %v1392_v18 = vpop.f32.mrf.mxu1 }
 0x1cc   : > { %v836_v19 = vadd.f32 %v1391_v16, %v1922_v20  ;;  %v905_v21 = vsel %vm873_vm10, %v831_v9, %v889_v17 }
 0x1cd   : > { %v1393_v22 = vpop.f32.mrf.mxu1  ;;  %1484 = vmatmul.mubr.f32.gmra.mxu0 %v905_v21 }
 0x1ce   : > { %v1394_v23 = vadd.f32 %v1393_v22, %v1392_v18  ;;  %vm874_vm11 = vcmp.gt.f32.partialorder %v836_v19, 0.0  ;;  %v890_v24 = vmul.f32 0.1, %v836_v19 }
 0x1cf   : > { %v1395_v25 = vpop.f32.mrf.mxu1 }
 0x1d0   : > { %v841_v26 = vadd.f32 %v1394_v23, %v1922_v20  ;;  %v906_v27 = vsel %vm874_vm11, %v836_v19, %v890_v24 }
 0x1d1   : > { %v1396_v28 = vpop.f32.mrf.mxu1  ;;  %1486 = vmatprep.mubr.f32.mxu0 %v906_v27 }
 0x1d2   : > { %v1397_v29 = vadd.f32 %v1396_v28, %v1395_v25  ;;  %vm875_vm12 = vcmp.gt.f32.partialorder %v841_v26, 0.0  ;;  %v891_v30 = vmul.f32 0.1, %v841_v26 }
 0x1d3   : > { %v1398_v31 = vpop.f32.mrf.mxu1 }
 0x1d4   : > { %v846_v32 = vadd.f32 %v1397_v29, %v1922_v20  ;;  %v907_v33 = vsel %vm875_vm12, %v841_v26, %v891_v30 }
 0x1d5   : > { %v1399_v34 = vpop.f32.mrf.mxu1  ;;  %1487 = vmatmul.mubr.f32.gmra.mxu0 %v907_v33 }
 0x1d6   : > { %v1400_v35 = vadd.f32 %v1399_v34, %v1398_v31  ;;  %vm876_vm13 = vcmp.gt.f32.partialorder %v846_v32, 0.0  ;;  %v892_v36 = vmul.f32 0.1, %v846_v32 }
 0x1d7   : > { %v1401_v37 = vpop.f32.mrf.mxu1 }
 0x1d8   : > { %v851_v38 = vadd.f32 %v1400_v35, %v1922_v20  ;;  %v908_v39 = vsel %vm876_vm13, %v846_v32, %v892_v36 }
 0x1d9   : > { %v1402_v40 = vpop.f32.mrf.mxu1  ;;  %1489 = vmatprep.mubr.f32.mxu0 %v908_v39 }
 0x1da   : > { %v1403_v41 = vadd.f32 %v1402_v40, %v1401_v37  ;;  %vm877_vm14 = vcmp.gt.f32.partialorder %v851_v38, 0.0  ;;  %v893_v42 = vmul.f32 0.1, %v851_v38 }
 0x1db   : > { %v1404_v43 = vpop.f32.mrf.mxu1 }
 0x1dc   : > { %v856_v44 = vadd.f32 %v1403_v41, %v1922_v20  ;;  %v909_v45 = vsel %vm877_vm14, %v851_v38, %v893_v42 }
 0x1dd   : > { %v1405_v46 = vpop.f32.mrf.mxu1  ;;  %1490 = vmatmul.mubr.f32.gmra.mxu0 %v909_v45 }
 0x1de   : > { %v1406_v47 = vadd.f32 %v1405_v46, %v1404_v43  ;;  %vm878_vm15 = vcmp.gt.f32.partialorder %v856_v44, 0.0  ;;  %v894_v48 = vmul.f32 0.1, %v856_v44 }
 0x1e0   : > { %v861_v49 = vadd.f32 %v1406_v47, %v1922_v20  ;;  %v910_v50 = vsel %vm878_vm15, %v856_v44, %v894_v48  ;;  %v1950_v20 = vld [vmem:[%s2047_s7] ss:$0 sm:$0xff] }
 0x1e1   : > { %1492 = vmatprep.mubr.f32.mxu1 %v910_v50 }
 0x1e2   : > { %vm879_vm0 = vcmp.gt.f32.partialorder %v861_v49, 0.0  ;;  %v895_v51 = vmul.f32 0.1, %v861_v49 }
 0x1e4   : > { %v911_v52 = vsel %vm879_vm0, %v861_v49, %v895_v51 }
 0x1e5   : > { %1493 = vmatmul.mubr.f32.vlgmr.msra.gmra.mxu1 %v911_v52 }
 0x26d   : > { %v1473_v54 = vpop.f32.mrf.mxu0 }
 0x26e   : > { %v1007_v55 = vadd.f32 %v1473_v54, %v1943_v53 }
 0x26f   : > { %v1001_v56 = vpop.f32.mrf.mxu0 }
 0x270   : > { %v1097_v57 = vmul.f32 0.1, %v1007_v55  ;;  %v1002_v58 = vadd.f32 %v1943_v53, %v1001_v56  ;;  %vm1081_vm1 = vcmp.gt.f32.partialorder %v1007_v55, 0.0 }
 0x272   : > { %vm1080_vm2 = vcmp.gt.f32.partialorder %v1002_v58, 0.0  ;;  %v1096_v59 = vmul.f32 0.1, %v1002_v58  ;;  %v1113_v60 = vsel %vm1081_vm1, %v1007_v55, %v1097_v57 }
 0x273   : > { %v1136_v61 = vmul.f32 %v1950_v20, %v1113_v60 }
 0x274   : > { %v1112_v62 = vsel %vm1080_vm2, %v1002_v58, %v1096_v59  ;;  %vm1223_vm2 = vcmask 7168  }
 0x275   : > { %v1476_v63 = vpop.f32.mrf.mxu0  ;;  %v1155_v0 = vsel %vm1151_vm3, %v1136_v61, 0.0  ;;  %v1135_v1 = vmul.f32 %v1950_v20, %v1112_v62 }
 0x276   : > { %v1017_v3 = vadd.f32 %v1476_v63, %v1943_v53  ;;  %1156 = vadd.xlane.f32.xlu0 %v1155_v0 }
 0x277   : > { %v1011_v4 = vpop.f32.mrf.mxu0  ;;  %v1152_v7 = vsel %vm1151_vm3, %v1135_v1, 0.0 }
 0x278   : > { %v1099_v5 = vmul.f32 0.1, %v1017_v3  ;;  %v1012_v6 = vadd.f32 %v1943_v53, %v1011_v4  ;;  %vm1083_vm4 = vcmp.gt.f32.partialorder %v1017_v3, 0.0 }
 0x27a   : > { %vm1082_vm5 = vcmp.gt.f32.partialorder %v1012_v6, 0.0  ;;  %v1098_v2 = vmul.f32 0.1, %v1012_v6  ;;  %1153 = vadd.xlane.f32.xlu0 %v1152_v7  ;;  %v1115_v10 = vsel %vm1083_vm4, %v1017_v3, %v1099_v5 }
 0x27b   : > { %v1138_v11 = vmul.f32 %v1950_v20, %v1115_v10 }
 0x27c   : > { %v1114_v12 = vsel %vm1082_vm5, %v1012_v6, %v1098_v2 }
 0x27d   : > { %v1479_v13 = vpop.f32.mrf.mxu0  ;;  %v1161_v8 = vsel %vm1151_vm3, %v1138_v11, 0.0  ;;  %v1137_v9 = vmul.f32 %v1950_v20, %v1114_v12 }
 0x27e   : > { %v1027_v14 = vadd.f32 %v1479_v13, %v1943_v53  ;;  %1162 = vadd.xlane.f32.xlu1 %v1161_v8 }
 0x27f   : > { %v1021_v15 = vpop.f32.mrf.mxu0  ;;  %v1158_v18 = vsel %vm1151_vm3, %v1137_v9, 0.0 }
 0x280   : > { %vm1085_vm6 = vcmp.gt.f32.partialorder %v1027_v14, 0.0  ;;  %v1101_v16 = vmul.f32 0.1, %v1027_v14  ;;  %v1022_v17 = vadd.f32 %v1943_v53, %v1021_v15 }
 0x282   : > { %vm1084_vm7 = vcmp.gt.f32.partialorder %v1022_v17, 0.0  ;;  %v1100_v19 = vmul.f32 0.1, %v1022_v17  ;;  %1159 = vadd.xlane.f32.xlu1 %v1158_v18  ;;  %v1117_v21 = vsel %vm1085_vm6, %v1027_v14, %v1101_v16 }
 0x283   : > { %v1140_v22 = vmul.f32 %v1950_v20, %v1117_v21 }
 0x284   : > { %v1116_v23 = vsel %vm1084_vm7, %v1022_v17, %v1100_v19 }
 0x285   : > { %v1482_v24 = vpop.f32.mrf.mxu0  ;;  %v1167_v25 = vsel %vm1151_vm3, %v1140_v22, 0.0  ;;  %v1139_v26 = vmul.f32 %v1950_v20, %v1116_v23 }
 0x286   : > { %v1037_v27 = vadd.f32 %v1482_v24, %v1943_v53  ;;  %1168 = vadd.xlane.f32.xlu1 %v1167_v25  ;;  %v1324_v25 = vld [vmem:[#allocation2] ss:$0 sm:$0xff] }
 0x287   : > { %v1031_v28 = vpop.f32.mrf.mxu0  ;;  %v1164_v29 = vsel %vm1151_vm3, %v1139_v26, 0.0 }
 0x288   : > { %vm1087_vm8 = vcmp.gt.f32.partialorder %v1037_v27, 0.0  ;;  %v1103_v30 = vmul.f32 0.1, %v1037_v27  ;;  %v1032_v31 = vadd.f32 %v1943_v53, %v1031_v28  ;;  %1165 = vadd.xlane.f32.xlu0 %v1164_v29 }
 0x28a   : > { %vm1086_vm9 = vcmp.gt.f32.partialorder %v1032_v31, 0.0  ;;  %v1102_v32 = vmul.f32 0.1, %v1032_v31  ;;  %v1119_v33 = vsel %vm1087_vm8, %v1037_v27, %v1103_v30 }
 0x28b   : > { %v1142_v34 = vmul.f32 %v1950_v20, %v1119_v33 }
 0x28c   : > { %v1118_v35 = vsel %vm1086_vm9, %v1032_v31, %v1102_v32 }
 0x28d   : > { %v1485_v36 = vpop.f32.mrf.mxu0  ;;  %v1173_v37 = vsel %vm1151_vm3, %v1142_v34, 0.0  ;;  %v1141_v38 = vmul.f32 %v1950_v20, %v1118_v35 }
 0x28e   : > { %v1047_v39 = vadd.f32 %v1485_v36, %v1943_v53  ;;  %1174 = vadd.xlane.f32.xlu1 %v1173_v37 }
 0x28f   : > { %v1041_v40 = vpop.f32.mrf.mxu0  ;;  %v1170_v41 = vsel %vm1151_vm3, %v1141_v38, 0.0 }
 0x290   : > { %vm1089_vm10 = vcmp.gt.f32.partialorder %v1047_v39, 0.0  ;;  %v1105_v42 = vmul.f32 0.1, %v1047_v39  ;;  %v1042_v43 = vadd.f32 %v1943_v53, %v1041_v40  ;;  %1171 = vadd.xlane.f32.xlu0 %v1170_v41 }
 0x292   : > { %vm1088_vm11 = vcmp.gt.f32.partialorder %v1042_v43, 0.0  ;;  %v1104_v44 = vmul.f32 0.1, %v1042_v43  ;;  %v1121_v45 = vsel %vm1089_vm10, %v1047_v39, %v1105_v42 }
 0x293   : > { %v1144_v46 = vmul.f32 %v1950_v20, %v1121_v45 }
 0x294   : > { %v1120_v47 = vsel %vm1088_vm11, %v1042_v43, %v1104_v44 }
 0x295   : > { %v1488_v48 = vpop.f32.mrf.mxu0  ;;  %v1179_v49 = vsel %vm1151_vm3, %v1144_v46, 0.0  ;;  %v1143_v50 = vmul.f32 %v1950_v20, %v1120_v47 }
 0x296   : > { %v1057_v51 = vadd.f32 %v1488_v48, %v1943_v53  ;;  %1180 = vadd.xlane.f32.xlu1 %v1179_v49 }
 0x297   : > { %v1051_v52 = vpop.f32.mrf.mxu0  ;;  %v1176_v54 = vsel %vm1151_vm3, %v1143_v50, 0.0 }
 0x298   : > { %vm1091_vm12 = vcmp.gt.f32.partialorder %v1057_v51, 0.0  ;;  %v1107_v55 = vmul.f32 0.1, %v1057_v51  ;;  %v1052_v56 = vadd.f32 %v1943_v53, %v1051_v52  ;;  %1177 = vadd.xlane.f32.xlu0 %v1176_v54 }
 0x29a   : > { %vm1090_vm13 = vcmp.gt.f32.partialorder %v1052_v56, 0.0  ;;  %v1106_v57 = vmul.f32 0.1, %v1052_v56  ;;  %v1123_v58 = vsel %vm1091_vm12, %v1057_v51, %v1107_v55 }
 0x29b   : > { %v1146_v59 = vmul.f32 %v1950_v20, %v1123_v58 }
 0x29c   : > { %v1122_v60 = vsel %vm1090_vm13, %v1052_v56, %v1106_v57 }
 0x29d   : > { %v1491_v61 = vpop.f32.mrf.mxu0  ;;  %v1185_v62 = vsel %vm1151_vm3, %v1146_v59, 0.0  ;;  %v1145_v63 = vmul.f32 %v1950_v20, %v1122_v60 }
 0x29e   : > { %v1067_v0 = vadd.f32 %v1491_v61, %v1943_v53  ;;  %1186 = vadd.xlane.f32.xlu1 %v1185_v62 }
 0x29f   : > { %v1061_v1 = vpop.f32.mrf.mxu0  ;;  %v1182_v3 = vsel %vm1151_vm3, %v1145_v63, 0.0 }
 0x2a0   : > { %vm1093_vm14 = vcmp.gt.f32.partialorder %v1067_v0, 0.0  ;;  %v1109_v4 = vmul.f32 0.1, %v1067_v0  ;;  %v1062_v5 = vadd.f32 %v1943_v53, %v1061_v1  ;;  %1183 = vadd.xlane.f32.xlu0 %v1182_v3 }
 0x2a2   : > { %vm1092_vm15 = vcmp.gt.f32.partialorder %v1062_v5, 0.0  ;;  %v1108_v6 = vmul.f32 0.1, %v1062_v5  ;;  %v1125_v7 = vsel %vm1093_vm14, %v1067_v0, %v1109_v4 }
 0x2a3   : > { %v1148_v2 = vmul.f32 %v1950_v20, %v1125_v7 }
 0x2a4   : > { %v1124_v10 = vsel %vm1092_vm15, %v1062_v5, %v1108_v6 }
 0x2a5   : > { %v1494_v11 = vpop.f32.mrf.mxu1  ;;  %v1191_v12 = vsel %vm1151_vm3, %v1148_v2, 0.0  ;;  %v1147_v13 = vmul.f32 %v1950_v20, %v1124_v10 }
 0x2a6   : > { %v1077_v8 = vadd.f32 %v1494_v11, %v1943_v53  ;;  %1192 = vadd.xlane.f32.xlu1 %v1191_v12 }
 0x2a7   : > { %v1071_v9 = vpop.f32.mrf.mxu1  ;;  %v1188_v14 = vsel %vm1151_vm3, %v1147_v13, 0.0 }
 0x2a8   : > { %vm1095_vm0 = vcmp.gt.f32.partialorder %v1077_v8, 0.0  ;;  %v1111_v15 = vmul.f32 0.1, %v1077_v8  ;;  %v1072_v16 = vadd.f32 %v1943_v53, %v1071_v9  ;;  %1189 = vadd.xlane.f32.xlu0 %v1188_v14 }
 0x2aa   : > { %vm1094_vm1 = vcmp.gt.f32.partialorder %v1072_v16, 0.0  ;;  %v1110_v17 = vmul.f32 0.1, %v1072_v16  ;;  %v1127_v18 = vsel %vm1095_vm0, %v1077_v8, %v1111_v15 }
 0x2ab   : > { %v1150_v19 = vmul.f32 %v1950_v20, %v1127_v18 }
 0x2ac   : > { %v1126_v21 = vsel %vm1094_vm1, %v1072_v16, %v1110_v17 }
 0x2ad   : > { %v1197_v22 = vsel %vm1151_vm3, %v1150_v19, 0.0  ;;  %v1149_v23 = vmul.f32 %v1950_v20, %v1126_v21 }
 0x2ae   : > { %1198 = vadd.xlane.f32.xlu1 %v1197_v22 }
 0x2af   : > { %v1194_v24 = vsel %vm1151_vm3, %v1149_v23, 0.0 }
 0x2b0   : > { %1195 = vadd.xlane.f32.xlu0 %v1194_v24 }
 0x2ff   : > { %v1157_v53 = vpop.xlane.xlu0 %1156 }
 0x300   : > { %v1208_v26 = vadd.f32 %v1324_v25, %v1157_v53 }
 0x302   : > { %1225 = vst.msk [vmem:[%s2003_s26 + $0x8] sm:$0xff] %vm1223_vm2, %v1208_v26 }
 0x303   : > { %v1154_v20 = vpop.xlane.xlu0 %1153 }
 0x304   : > { %v1207_v27 = vadd.f32 %v1324_v25, %v1154_v20 }
 0x306   : > { %1224 = vst.msk [vmem:[%s2003_s26] sm:$0xff] %vm1223_vm2, %v1207_v27 }
 0x307   : > { %v1163_v28 = vpop.xlane.xlu1 %1162 }
 0x308   : > { %v1210_v29 = vadd.f32 %v1324_v25, %v1163_v28 }
 0x30a   : > { %1227 = vst.msk [vmem:[%s2003_s26 + $0x18] sm:$0xff] %vm1223_vm2, %v1210_v29 }
 0x30b   : > { %v1160_v30 = vpop.xlane.xlu1 %1159 }
 0x30c   : > { %v1209_v31 = vadd.f32 %v1324_v25, %v1160_v30 }
 0x30e   : > { %1226 = vst.msk [vmem:[%s2003_s26 + $0x10] sm:$0xff] %vm1223_vm2, %v1209_v31 }
 0x30f   : > { %v1169_v32 = vpop.xlane.xlu1 %1168 }
 0x310   : > { %v1212_v33 = vadd.f32 %v1324_v25, %v1169_v32 }
 0x311   : > { %v1166_v34 = vpop.xlane.xlu0 %1165 }
 0x312   : > { %1229 = vst.msk [vmem:[%s2003_s26 + $0x28] sm:$0xff] %vm1223_vm2, %v1212_v33  ;;  %v1211_v35 = vadd.f32 %v1324_v25, %v1166_v34 }
 0x314   : > { %1228 = vst.msk [vmem:[%s2003_s26 + $0x20] sm:$0xff] %vm1223_vm2, %v1211_v35 }
 0x317   : > { %v1175_v36 = vpop.xlane.xlu1 %1174 }
 0x318   : > { %v1214_v37 = vadd.f32 %v1324_v25, %v1175_v36 }
 0x319   : > { %v1172_v38 = vpop.xlane.xlu0 %1171 }
 0x31a   : > { %1231 = vst.msk [vmem:[%s2003_s26 + $0x38] sm:$0xff] %vm1223_vm2, %v1214_v37  ;;  %v1213_v39 = vadd.f32 %v1324_v25, %v1172_v38 }
 0x31c   : > { %1230 = vst.msk [vmem:[%s2003_s26 + $0x30] sm:$0xff] %vm1223_vm2, %v1213_v39 }
 0x31f   : > { %v1181_v40 = vpop.xlane.xlu1 %1180 }
 0x320   : > { %v1216_v41 = vadd.f32 %v1324_v25, %v1181_v40 }
 0x321   : > { %v1178_v42 = vpop.xlane.xlu0 %1177 }
 0x322   : > { %1233 = vst.msk [vmem:[%s2003_s26 + $0x48] sm:$0xff] %vm1223_vm2, %v1216_v41  ;;  %v1215_v43 = vadd.f32 %v1324_v25, %v1178_v42 }
 0x324   : > { %1232 = vst.msk [vmem:[%s2003_s26 + $0x40] sm:$0xff] %vm1223_vm2, %v1215_v43 }
 0x327   : > { %v1187_v44 = vpop.xlane.xlu1 %1186 }
 0x328   : > { %v1218_v45 = vadd.f32 %v1324_v25, %v1187_v44 }
 0x329   : > { %v1184_v46 = vpop.xlane.xlu0 %1183 }
 0x32a   : > { %1235 = vst.msk [vmem:[%s2003_s26 + $0x58] sm:$0xff] %vm1223_vm2, %v1218_v45  ;;  %v1217_v47 = vadd.f32 %v1324_v25, %v1184_v46 }
 0x32c   : > { %1234 = vst.msk [vmem:[%s2003_s26 + $0x50] sm:$0xff] %vm1223_vm2, %v1217_v47 }
 0x32f   : > { %v1193_v48 = vpop.xlane.xlu1 %1192 }
 0x330   : > { %v1220_v49 = vadd.f32 %v1324_v25, %v1193_v48 }
 0x331   : > { %v1190_v50 = vpop.xlane.xlu0 %1189 }
 0x332   : > { %1237 = vst.msk [vmem:[%s2003_s26 + $0x68] sm:$0xff] %vm1223_vm2, %v1220_v49  ;;  %v1219_v51 = vadd.f32 %v1324_v25, %v1190_v50 }
 0x334   : > { %1236 = vst.msk [vmem:[%s2003_s26 + $0x60] sm:$0xff] %vm1223_vm2, %v1219_v51 }
 0x337   : > { %v1199_v52 = vpop.xlane.xlu1 %1198 }
 0x338   : > { %v1222_v54 = vadd.f32 %v1324_v25, %v1199_v52 }
 0x339   : > { %v1196_v55 = vpop.xlane.xlu0 %1195 }
 0x33a   : > { %1239 = vst.msk [vmem:[%s2003_s26 + $0x78] sm:$0xff] %vm1223_vm2, %v1222_v54  ;;  %v1221_v56 = vadd.f32 %v1324_v25, %v1196_v55 }
 0x33c   : > { %1238 = vst.msk [vmem:[%s2003_s26 + $0x70] sm:$0xff] %vm1223_vm2, %v1221_v56 }
 0x33d PF: > { %s21_s11 = sadd.s32 1, %s1542_s11  }
 0x33e   : > { %p18_p4 = scmp.ge.s32.totalorder %s21_s11, 4  }
 0x340   :  { %20 = sbr.rel (!%p18_p4) target bundleno = 3 (0x3), region = 86 }

</bundles_post_ra>
